<compile_context>
chip_gen: v7x
topology: tpu7x:2x2x1
jax: 0.10.0
libtpu: 0.0.40
codegen_flags: <defaults>
</compile_context>

<pallas_src>
import jax
import jax.numpy as jnp
from jax import lax
from jax.experimental import pallas as pl
from jax.experimental.pallas import tpu as pltpu


# 3x3 taps excluding the centre (dh, dw) -> input offset (h+dh, w+dw)
_TAPS = ((-1, -1), (-1, 0), (-1, 1), (0, -1), (0, 1), (1, -1), (1, 0), (1, 1))


def _make_kernel(nb, c, c3, tr, w):
    t = tr * w

    def kernel(x_ref, ht_ref, hb_ref, wm_ref, wt_ref, b_ref, o_ref):
        # x_ref : (nb, c, t)      input tile; channels on sublanes, rows*W flattened on lanes
        # ht_ref: (nb, 1, c3, w)  image row just above the tile (zeros at the image top)
        # hb_ref: (nb, 1, c3, w)  image row just below the tile (zeros at the image bottom)
        # wm_ref: (c, c)          BN-folded 1x1 weight, centre 3x3 tap folded into cols [:c3]
        # wt_ref: (8, c, c3)      BN-folded 1x1 weight folded through the 8 non-centre taps
        # b_ref : (c, 1)          folded BatchNorm bias
        # o_ref : (nb, c, t)      output tile (same lane-dense orientation as the input)
        col = lax.broadcasted_iota(jnp.int32, (c3, t), 1) % w
        first_col = col == 0
        last_col = col == w - 1

        wm = wm_ref[...]
        bias = b_ref[...]

        def left(v):   # value at (h+dh, w-1); zero outside the row
            if t == 1:
                return jnp.zeros_like(v)
            shifted = jnp.concatenate(
                [jnp.zeros((c3, 1), v.dtype), v[:, : t - 1]], axis=1)
            return jnp.where(first_col, jnp.zeros_like(v), shifted)

        def right(v):  # value at (h+dh, w+1); zero outside the row
            if t == 1:
                return jnp.zeros_like(v)
            shifted = jnp.concatenate(
                [v[:, 1:], jnp.zeros((c3, 1), v.dtype)], axis=1)
            return jnp.where(last_col, jnp.zeros_like(v), shifted)

        for b in range(nb):
            # Single fused (C, C) matmul: 1x1 conv over all channels with the centre 3x3
            # tap pre-folded into the first c3 input columns.
            acc = jnp.dot(wm, x_ref[b], preferred_element_type=jnp.float32)

            # Shifted views of the first c3 channels for the remaining 8 taps.
            x3 = x_ref[b, 0:c3, :]                                   # (c3, t)
            if t == w:                                               # single-row tile
                above = ht_ref[b, 0]
                below = hb_ref[b, 0]
            else:
                above = jnp.concatenate([ht_ref[b, 0], x3[:, : t - w]], axis=1)
                below = jnp.concatenate([x3[:, w:], hb_ref[b, 0]], axis=1)

            for i, (dh, dw) in enumerate(_TAPS):
                v = above if dh < 0 else (below if dh > 0 else x3)
                if dw < 0:
                    v = left(v)
                elif dw > 0:
                    v = right(v)
                acc = acc + jnp.dot(wt_ref[i], v,
                                    preferred_element_type=jnp.float32)

            z = jnp.maximum(acc + bias, 0.0)                         # folded BN bias + ReLU
            # Residual in f32; fresh VMEM read keeps the f32 x tile's live range short.
            o_ref[b] = (x_ref[b].astype(jnp.float32) + z).astype(o_ref.dtype)

    return kernel


def _step_vmem_bytes(nb, c, c3, t, itemsize):
    """Rough per-grid-step VMEM footprint (double-buffered I/O blocks + live temporaries)."""
    io = 2 * 2 * nb * c * t * itemsize             # x block + out block, double buffered
    acc = nb * c * t * 4                           # f32 accumulator
    tmp = nb * 6 * c3 * t * max(itemsize, 4)       # shifted copies / masks
    return io + acc + tmp + (2 << 20)              # weights, halos, slack


def _vmem_budget():
    cap = 128 << 20                                # v5e/v6e physical VMEM
    try:
        cap = int(pltpu.get_tpu_info().vmem_capacity_bytes)   # 64 MiB on v7x
    except Exception:
        pass
    budget = max(16 << 20, min(int(cap * 0.35), 48 << 20))
    return budget, cap


def _choose_rows(n, c, c3, h, w, itemsize, budget):
    """Rows per tile: TR | H and TR*W lane-aligned (or the whole image). Largest tile that
    fits the budget, preferring choices that leave >= 4 grid steps (v7x 2-TC occupancy)."""
    cand = [tr for tr in range(1, h + 1)
            if h % tr == 0 and ((tr * w) % 128 == 0 or tr == h)]
    fitting = [tr for tr in cand
               if _step_vmem_bytes(1, c, c3, tr * w, itemsize) <= budget]
    if not fitting:
        fitting = [min(cand)]                      # best effort; vmem_limit raised below
    busy = [tr for tr in fitting if n * (h // tr) >= 4]
    return max(busy) if busy else max(fitting)


def _choose_batch(n, c, c3, t, n_tiles, itemsize, budget):
    """Batch-block size: amortize per-step overhead when C*T blocks are small, while keeping
    >= 4 grid steps when possible and staying inside the VMEM budget."""
    best = 1
    for nb in range(1, n + 1):
        if n % nb:
            continue
        if _step_vmem_bytes(nb, c, c3, t, itemsize) > budget:
            break
        if nb > 1 and (n // nb) * n_tiles < 4:
            continue
        best = nb
        if nb * c * t * itemsize >= (1 << 20):     # >= 1 MiB moved per step is plenty
            break
    return best


def mlp_block_forward(x, pconv_w, mlp_w, bn_gamma, bn_beta, bn_mean, bn_var,
                      *, n_div=4, eps=1e-5):
    """Fused MLPBlock forward.  x: (N, C, H, W) NCHW.  pconv_w: (C//n_div, C//n_div, 3, 3).
    mlp_w: (C, C, 1, 1).  bn_*: (C,).  Output dtype follows x.dtype (f32 or bf16)."""
    n, c, h, w = x.shape
    assert c % n_div == 0, "dim must be divisible by n_div"
    c3 = c // n_div
    hw = h * w

    # ---- fold BatchNorm2d (inference) into the 1x1 weight and a per-channel bias -------
    w1 = mlp_w.reshape(c, c).astype(jnp.float32)                     # (C_out, C_in)
    inv = (bn_gamma / jnp.sqrt(bn_var + eps)).astype(jnp.float32)
    w1s = w1 * inv[:, None]
    bias = (bn_beta - bn_mean * inv).astype(jnp.float32).reshape(c, 1)

    # ---- fold the 3x3 partial-conv taps through the 1x1 so pc is never materialized ----
    k3 = pconv_w.astype(jnp.float32)                                 # (c3, c3, 3, 3) OIHW
    w_top = w1s[:, :c3]                                              # (C, c3)
    w_taps = jnp.stack(
        [w_top @ k3[:, :, dh + 1, dw + 1] for dh, dw in _TAPS])      # (8, C, c3)
    w_main = jnp.concatenate(
        [w_top @ k3[:, :, 1, 1], w1s[:, c3:]], axis=1)               # (C, C)

    # ---- generation-aware tiling --------------------------------------------------------
    itemsize = x.dtype.itemsize
    budget, cap = _vmem_budget()
    tr = _choose_rows(n, c, c3, h, w, itemsize, budget)
    t = tr * w
    n_tiles = h // tr
    nb = _choose_batch(n, c, c3, t, n_tiles, itemsize, budget)
    grid = (n // nb, n_tiles)

    ws = _step_vmem_bytes(nb, c, c3, t, itemsize)
    vmem_limit = int(min(cap * 0.9,
                         max(32 << 20, ws + (8 << 20), min(cap * 0.5, 64 << 20))))

    # ---- vertical halo rows (one above / below each row-tile; zeros at the border) -----
    x3 = x[:, :c3]                                                   # (N, c3, H, W)
    zrow = jnp.zeros((n, c3, 1, w), x.dtype)
    if n_tiles > 1:
        halo_top = jnp.concatenate([zrow, x3[:, :, tr - 1:h - 1:tr, :]], axis=2)
        halo_bot = jnp.concatenate([x3[:, :, tr:h:tr, :], zrow], axis=2)
    else:
        halo_top = zrow
        halo_bot = zrow
    halo_top = halo_top.transpose(0, 2, 1, 3)                        # (N, n_tiles, c3, W)
    halo_bot = halo_bot.transpose(0, 2, 1, 3)

    xf = x.reshape(n, c, hw)                                         # free reshape, NCHW kept

    cost = pl.CostEstimate(
        flops=int(2 * n * hw * c * (c + 8 * c3) + 4 * n * hw * c),
        transcendentals=0,
        bytes_accessed=int(2 * xf.size * itemsize
                           + (halo_top.size + halo_bot.size) * itemsize
                           + (w_main.size + w_taps.size + bias.size) * 4))

    kernel = _make_kernel(nb, c, c3, tr, w)
    out = pl.pallas_call(
        kernel,
        out_shape=jax.ShapeDtypeStruct((n, c, hw), x.dtype),
        grid=grid,
        in_specs=[
            pl.BlockSpec((nb, c, t), lambda bi, ti: (bi, 0, ti)),
            pl.BlockSpec((nb, 1, c3, w), lambda bi, ti: (bi, ti, 0, 0)),
            pl.BlockSpec((nb, 1, c3, w), lambda bi, ti: (bi, ti, 0, 0)),
            pl.BlockSpec((c, c), lambda bi, ti: (0, 0)),
            pl.BlockSpec((8, c, c3), lambda bi, ti: (0, 0, 0)),
            pl.BlockSpec((c, 1), lambda bi, ti: (0, 0)),
        ],
        out_specs=pl.BlockSpec((nb, c, t), lambda bi, ti: (bi, 0, ti)),
        compiler_params=pltpu.CompilerParams(
            dimension_semantics=("parallel", "parallel"),
            vmem_limit_bytes=vmem_limit),
        cost_estimate=cost,
    )(xf, halo_top, halo_bot, w_main, w_taps, bias)

    return out.reshape(n, c, h, w)


def _reference(x, pconv_w, mlp_w, gamma, beta, mean, var, *, n_div=4, eps=1e-5):
    n, c, h, w = x.shape
    c3 = c // n_div
    y1 = lax.conv_general_dilated(
        x[:, :c3], pconv_w, (1, 1), ((1, 1), (1, 1)),
        dimension_numbers=("NCHW", "OIHW", "NCHW"))
    y = jnp.concatenate([y1, x[:, c3:]], axis=1)
    z = lax.conv_general_dilated(
        y, mlp_w, (1, 1), ((0, 0), (0, 0)),
        dimension_numbers=("NCHW", "OIHW", "NCHW"))
    inv = gamma / jnp.sqrt(var + eps)
    z = z * inv[None, :, None, None] + (beta - mean * inv)[None, :, None, None]
    return x + jnp.maximum(z, 0.0)


if __name__ == "__main__":
    # Module config: dim=32, n_div=4, Conv2d(dim, dim, 1, bias=False) + BatchNorm2d + ReLU,
    # drop_path=0 (Identity), layer_scale_init_value=0 (plain forward).
    n, dim, h, w = 2, 32, 16, 16
    n_div = 4
    c3 = dim // n_div

    key = jax.random.PRNGKey(0)
    kx, kw3, kw1, kg, kb, km, kv = jax.random.split(key, 7)

    x = jax.random.normal(kx, (n, dim, h, w), dtype=jnp.float32)
    pconv_w = jax.random.normal(kw3, (c3, c3, 3, 3), dtype=jnp.float32) * 0.1
    mlp_w = jax.random.normal(kw1, (dim, dim, 1, 1), dtype=jnp.float32) * 0.1
    gamma = 1.0 + 0.1 * jax.random.normal(kg, (dim,), dtype=jnp.float32)
    beta = 0.1 * jax.random.normal(kb, (dim,), dtype=jnp.float32)
    mean = 0.1 * jax.random.normal(km, (dim,), dtype=jnp.float32)
    var = jnp.abs(1.0 + 0.1 * jax.random.normal(kv, (dim,), dtype=jnp.float32))

    out = mlp_block_forward(x, pconv_w, mlp_w, gamma, beta, mean, var, n_div=n_div)
    out = jax.block_until_ready(out)

    ref = _reference(x, pconv_w, mlp_w, gamma, beta, mean, var, n_div=n_div)
    assert out.shape == x.shape
    max_err = float(jnp.max(jnp.abs(out - ref)))
    assert jnp.allclose(out, ref, atol=2e-2, rtol=2e-2), f"mismatch vs reference: {max_err}"
    print("KERNEL_OK")
</pallas_src>

<mosaic_0001>
module attributes {stable_mosaic.version = 11 : i64} {
  func.func @kernel(%arg0: i32, %arg1: i32, %arg2: memref<1x32x128xf32, #tpu.memory_space<vmem>>, %arg3: memref<1x1x8x16xf32, #tpu.memory_space<vmem>>, %arg4: memref<1x1x8x16xf32, #tpu.memory_space<vmem>>, %arg5: memref<32x32xf32, #tpu.memory_space<vmem>>, %arg6: memref<8x32x8xf32, #tpu.memory_space<vmem>>, %arg7: memref<32x1xf32, #tpu.memory_space<vmem>>, %arg8: memref<1x32x128xf32, #tpu.memory_space<vmem>>) attributes {dimension_semantics = [#tpu.dimension_semantics<parallel>, #tpu.dimension_semantics<parallel>], iteration_bounds = array<i64: 2, 2>, scalar_prefetch = 0 : i64, scratch_operands = 0 : i64, tpu.core_type = #tpu.core_type<tc>, window_params = [{transform_indices = @transform_0, window_bounds = array<i64: 1, 32, 128>}, {transform_indices = @transform_1, window_bounds = array<i64: 1, 1, 8, 16>}, {transform_indices = @transform_2, window_bounds = array<i64: 1, 1, 8, 16>}, {pipeline_mode = #tpu.pipeline_mode<synchronous>, transform_indices = @transform_3, window_bounds = array<i64: 32, 32>}, {pipeline_mode = #tpu.pipeline_mode<synchronous>, transform_indices = @transform_4, window_bounds = array<i64: 8, 32, 8>}, {pipeline_mode = #tpu.pipeline_mode<synchronous>, transform_indices = @transform_5, window_bounds = array<i64: 32, 1>}, {transform_indices = @transform_6, window_bounds = array<i64: 1, 32, 128>}]} {
    %0 = tpu.iota {dimensions = array<i32: 1>} : vector<8x128xi32>
    %c16_i32 = arith.constant 16 : i32
    %c0_i32 = arith.constant 0 : i32
    %1 = arith.cmpi eq, %c16_i32, %c0_i32 : i32
    %c1_i32 = arith.constant 1 : i32
    %2 = arith.select %1, %c1_i32, %c16_i32 : i32
    %3 = vector.broadcast %2 : i32 to vector<8x128xi32>
    %4 = arith.remsi %0, %3 : vector<8x128xi32>
    %c0_i32_0 = arith.constant 0 : i32
    %5 = vector.broadcast %c0_i32_0 : i32 to vector<8x128xi32>
    %6 = arith.cmpi ne, %4, %5 : vector<8x128xi32>
    %c0_i32_1 = arith.constant 0 : i32
    %7 = vector.broadcast %c0_i32_1 : i32 to vector<8x128xi32>
    %8 = arith.cmpi slt, %4, %7 : vector<8x128xi32>
    %c0_i32_2 = arith.constant 0 : i32
    %9 = arith.cmpi slt, %2, %c0_i32_2 : i32
    %10 = vector.broadcast %9 : i1 to vector<8x128xi1>
    %11 = vector.broadcast %10 : vector<8x128xi1> to vector<8x128xi1>
    %12 = arith.xori %8, %11 : vector<8x128xi1>
    %13 = arith.andi %12, %6 : vector<8x128xi1>
    %14 = vector.broadcast %2 : i32 to vector<8x128xi32>
    %15 = arith.addi %4, %14 : vector<8x128xi32>
    %16 = arith.select %13, %15, %4 : vector<8x128xi1>, vector<8x128xi32>
    %c0_i32_3 = arith.constant 0 : i32
    %17 = vector.broadcast %c0_i32_3 : i32 to vector<8x128xi32>
    %18 = arith.cmpi eq, %16, %17 : vector<8x128xi32>
    %c15_i32 = arith.constant 15 : i32
    %19 = vector.broadcast %c15_i32 : i32 to vector<8x128xi32>
    %20 = arith.cmpi eq, %16, %19 : vector<8x128xi32>
    %c0 = arith.constant 0 : index
    %c0_4 = arith.constant 0 : index
    %21 = vector.load %arg5[%c0, %c0_4] : memref<32x32xf32, #tpu.memory_space<vmem>>, vector<32x32xf32>
    %c0_5 = arith.constant 0 : index
    %c0_6 = arith.constant 0 : index
    %22 = vector.load %arg7[%c0_5, %c0_6] : memref<32x1xf32, #tpu.memory_space<vmem>>, vector<32x1xf32>
    %c0_7 = arith.constant 0 : index
    %c0_8 = arith.constant 0 : index
    %c0_9 = arith.constant 0 : index
    %23 = vector.load %arg2[%c0_7, %c0_8, %c0_9] : memref<1x32x128xf32, #tpu.memory_space<vmem>>, vector<1x32x128xf32>
    %24 = vector.shape_cast %23 : vector<1x32x128xf32> to vector<32x128xf32>
    %cst = arith.constant dense<0.000000e+00> : vector<32x128xf32>
    %25 = tpu.matmul %21, %24, %cst {dimension_numbers = #tpu.dot_dimension_numbers<[1], [0], [0], [1], [0, 0, 1, 1], [], []>} : vector<32x32xf32>, vector<32x128xf32>, vector<32x128xf32> -> vector<32x128xf32>
    %c0_10 = arith.constant 0 : index
    %c0_11 = arith.constant 0 : index
    %c0_12 = arith.constant 0 : index
    %26 = vector.load %arg2[%c0_10, %c0_11, %c0_12] : memref<1x32x128xf32, #tpu.memory_space<vmem>>, vector<1x8x128xf32>
    %27 = vector.shape_cast %26 : vector<1x8x128xf32> to vector<8x128xf32>
    %c0_13 = arith.constant 0 : index
    %c0_14 = arith.constant 0 : index
    %c0_15 = arith.constant 0 : index
    %c0_16 = arith.constant 0 : index
    %28 = vector.load %arg3[%c0_13, %c0_14, %c0_15, %c0_16] : memref<1x1x8x16xf32, #tpu.memory_space<vmem>>, vector<1x1x8x16xf32>
    %29 = vector.shape_cast %28 : vector<1x1x8x16xf32> to vector<8x16xf32>
    %30 = vector.extract_strided_slice %27 {offsets = [0, 0], sizes = [8, 112], strides = [1, 1]} : vector<8x128xf32> to vector<8x112xf32>
    %31 = tpu.concatenate %29, %30 in 1 : vector<8x16xf32>, vector<8x112xf32> -> vector<8x128xf32>
    %32 = vector.extract_strided_slice %27 {offsets = [0, 16], sizes = [8, 112], strides = [1, 1]} : vector<8x128xf32> to vector<8x112xf32>
    %c0_17 = arith.constant 0 : index
    %c0_18 = arith.constant 0 : index
    %c0_19 = arith.constant 0 : index
    %c0_20 = arith.constant 0 : index
    %33 = vector.load %arg4[%c0_17, %c0_18, %c0_19, %c0_20] : memref<1x1x8x16xf32, #tpu.memory_space<vmem>>, vector<1x1x8x16xf32>
    %34 = vector.shape_cast %33 : vector<1x1x8x16xf32> to vector<8x16xf32>
    %35 = tpu.concatenate %32, %34 in 1 : vector<8x112xf32>, vector<8x16xf32> -> vector<8x128xf32>
    %cst_21 = arith.constant 0.000000e+00 : f32
    %36 = vector.broadcast %cst_21 : f32 to vector<8x1xf32>
    %37 = vector.extract_strided_slice %31 {offsets = [0, 0], sizes = [8, 127], strides = [1, 1]} : vector<8x128xf32> to vector<8x127xf32>
    %38 = tpu.concatenate %36, %37 in 1 : vector<8x1xf32>, vector<8x127xf32> -> vector<8x128xf32>
    %cst_22 = arith.constant 0.000000e+00 : f32
    %39 = vector.broadcast %cst_22 : f32 to vector<8x128xf32>
    %40 = arith.select %18, %39, %38 : vector<8x128xi1>, vector<8x128xf32>
    %c0_23 = arith.constant 0 : index
    %c0_24 = arith.constant 0 : index
    %c0_25 = arith.constant 0 : index
    %41 = vector.load %arg6[%c0_23, %c0_24, %c0_25] : memref<8x32x8xf32, #tpu.memory_space<vmem>>, vector<1x32x8xf32>
    %42 = vector.shape_cast %41 : vector<1x32x8xf32> to vector<32x8xf32>
    %cst_26 = arith.constant dense<0.000000e+00> : vector<32x128xf32>
    %43 = tpu.matmul %42, %40, %cst_26 {dimension_numbers = #tpu.dot_dimension_numbers<[1], [0], [0], [1], [0, 0, 1, 1], [], []>} : vector<32x8xf32>, vector<8x128xf32>, vector<32x128xf32> -> vector<32x128xf32>
    %44 = arith.addf %25, %43 : vector<32x128xf32>
    %c1 = arith.constant 1 : index
    %c0_27 = arith.constant 0 : index
    %c0_28 = arith.constant 0 : index
    %45 = vector.load %arg6[%c1, %c0_27, %c0_28] : memref<8x32x8xf32, #tpu.memory_space<vmem>>, vector<1x32x8xf32>
    %46 = vector.shape_cast %45 : vector<1x32x8xf32> to vector<32x8xf32>
    %cst_29 = arith.constant dense<0.000000e+00> : vector<32x128xf32>
    %47 = tpu.matmul %46, %31, %cst_29 {dimension_numbers = #tpu.dot_dimension_numbers<[1], [0], [0], [1], [0, 0, 1, 1], [], []>} : vector<32x8xf32>, vector<8x128xf32>, vector<32x128xf32> -> vector<32x128xf32>
    %48 = arith.addf %44, %47 : vector<32x128xf32>
    %49 = vector.extract_strided_slice %31 {offsets = [0, 1], sizes = [8, 127], strides = [1, 1]} : vector<8x128xf32> to vector<8x127xf32>
    %cst_30 = arith.constant 0.000000e+00 : f32
    %50 = vector.broadcast %cst_30 : f32 to vector<8x1xf32>
    %51 = tpu.concatenate %49, %50 in 1 : vector<8x127xf32>, vector<8x1xf32> -> vector<8x128xf32>
    %cst_31 = arith.constant 0.000000e+00 : f32
    %52 = vector.broadcast %cst_31 : f32 to vector<8x128xf32>
    %53 = arith.select %20, %52, %51 : vector<8x128xi1>, vector<8x128xf32>
    %c2 = arith.constant 2 : index
    %c0_32 = arith.constant 0 : index
    %c0_33 = arith.constant 0 : index
    %54 = vector.load %arg6[%c2, %c0_32, %c0_33] : memref<8x32x8xf32, #tpu.memory_space<vmem>>, vector<1x32x8xf32>
    %55 = vector.shape_cast %54 : vector<1x32x8xf32> to vector<32x8xf32>
    %cst_34 = arith.constant dense<0.000000e+00> : vector<32x128xf32>
    %56 = tpu.matmul %55, %53, %cst_34 {dimension_numbers = #tpu.dot_dimension_numbers<[1], [0], [0], [1], [0, 0, 1, 1], [], []>} : vector<32x8xf32>, vector<8x128xf32>, vector<32x128xf32> -> vector<32x128xf32>
    %57 = arith.addf %48, %56 : vector<32x128xf32>
    %cst_35 = arith.constant 0.000000e+00 : f32
    %58 = vector.broadcast %cst_35 : f32 to vector<8x1xf32>
    %59 = vector.extract_strided_slice %27 {offsets = [0, 0], sizes = [8, 127], strides = [1, 1]} : vector<8x128xf32> to vector<8x127xf32>
    %60 = tpu.concatenate %58, %59 in 1 : vector<8x1xf32>, vector<8x127xf32> -> vector<8x128xf32>
    %cst_36 = arith.constant 0.000000e+00 : f32
    %61 = vector.broadcast %cst_36 : f32 to vector<8x128xf32>
    %62 = arith.select %18, %61, %60 : vector<8x128xi1>, vector<8x128xf32>
    %c3 = arith.constant 3 : index
    %c0_37 = arith.constant 0 : index
    %c0_38 = arith.constant 0 : index
    %63 = vector.load %arg6[%c3, %c0_37, %c0_38] : memref<8x32x8xf32, #tpu.memory_space<vmem>>, vector<1x32x8xf32>
    %64 = vector.shape_cast %63 : vector<1x32x8xf32> to vector<32x8xf32>
    %cst_39 = arith.constant dense<0.000000e+00> : vector<32x128xf32>
    %65 = tpu.matmul %64, %62, %cst_39 {dimension_numbers = #tpu.dot_dimension_numbers<[1], [0], [0], [1], [0, 0, 1, 1], [], []>} : vector<32x8xf32>, vector<8x128xf32>, vector<32x128xf32> -> vector<32x128xf32>
    %66 = arith.addf %57, %65 : vector<32x128xf32>
    %67 = vector.extract_strided_slice %27 {offsets = [0, 1], sizes = [8, 127], strides = [1, 1]} : vector<8x128xf32> to vector<8x127xf32>
    %cst_40 = arith.constant 0.000000e+00 : f32
    %68 = vector.broadcast %cst_40 : f32 to vector<8x1xf32>
    %69 = tpu.concatenate %67, %68 in 1 : vector<8x127xf32>, vector<8x1xf32> -> vector<8x128xf32>
    %cst_41 = arith.constant 0.000000e+00 : f32
    %70 = vector.broadcast %cst_41 : f32 to vector<8x128xf32>
    %71 = arith.select %20, %70, %69 : vector<8x128xi1>, vector<8x128xf32>
    %c4 = arith.constant 4 : index
    %c0_42 = arith.constant 0 : index
    %c0_43 = arith.constant 0 : index
    %72 = vector.load %arg6[%c4, %c0_42, %c0_43] : memref<8x32x8xf32, #tpu.memory_space<vmem>>, vector<1x32x8xf32>
    %73 = vector.shape_cast %72 : vector<1x32x8xf32> to vector<32x8xf32>
    %cst_44 = arith.constant dense<0.000000e+00> : vector<32x128xf32>
    %74 = tpu.matmul %73, %71, %cst_44 {dimension_numbers = #tpu.dot_dimension_numbers<[1], [0], [0], [1], [0, 0, 1, 1], [], []>} : vector<32x8xf32>, vector<8x128xf32>, vector<32x128xf32> -> vector<32x128xf32>
    %75 = arith.addf %66, %74 : vector<32x128xf32>
    %cst_45 = arith.constant 0.000000e+00 : f32
    %76 = vector.broadcast %cst_45 : f32 to vector<8x1xf32>
    %77 = vector.extract_strided_slice %35 {offsets = [0, 0], sizes = [8, 127], strides = [1, 1]} : vector<8x128xf32> to vector<8x127xf32>
    %78 = tpu.concatenate %76, %77 in 1 : vector<8x1xf32>, vector<8x127xf32> -> vector<8x128xf32>
    %cst_46 = arith.constant 0.000000e+00 : f32
    %79 = vector.broadcast %cst_46 : f32 to vector<8x128xf32>
    %80 = arith.select %18, %79, %78 : vector<8x128xi1>, vector<8x128xf32>
    %c5 = arith.constant 5 : index
    %c0_47 = arith.constant 0 : index
    %c0_48 = arith.constant 0 : index
    %81 = vector.load %arg6[%c5, %c0_47, %c0_48] : memref<8x32x8xf32, #tpu.memory_space<vmem>>, vector<1x32x8xf32>
    %82 = vector.shape_cast %81 : vector<1x32x8xf32> to vector<32x8xf32>
    %cst_49 = arith.constant dense<0.000000e+00> : vector<32x128xf32>
    %83 = tpu.matmul %82, %80, %cst_49 {dimension_numbers = #tpu.dot_dimension_numbers<[1], [0], [0], [1], [0, 0, 1, 1], [], []>} : vector<32x8xf32>, vector<8x128xf32>, vector<32x128xf32> -> vector<32x128xf32>
    %84 = arith.addf %75, %83 : vector<32x128xf32>
    %c6 = arith.constant 6 : index
    %c0_50 = arith.constant 0 : index
    %c0_51 = arith.constant 0 : index
    %85 = vector.load %arg6[%c6, %c0_50, %c0_51] : memref<8x32x8xf32, #tpu.memory_space<vmem>>, vector<1x32x8xf32>
    %86 = vector.shape_cast %85 : vector<1x32x8xf32> to vector<32x8xf32>
    %cst_52 = arith.constant dense<0.000000e+00> : vector<32x128xf32>
    %87 = tpu.matmul %86, %35, %cst_52 {dimension_numbers = #tpu.dot_dimension_numbers<[1], [0], [0], [1], [0, 0, 1, 1], [], []>} : vector<32x8xf32>, vector<8x128xf32>, vector<32x128xf32> -> vector<32x128xf32>
    %88 = arith.addf %84, %87 : vector<32x128xf32>
    %89 = vector.extract_strided_slice %35 {offsets = [0, 1], sizes = [8, 127], strides = [1, 1]} : vector<8x128xf32> to vector<8x127xf32>
    %cst_53 = arith.constant 0.000000e+00 : f32
    %90 = vector.broadcast %cst_53 : f32 to vector<8x1xf32>
    %91 = tpu.concatenate %89, %90 in 1 : vector<8x127xf32>, vector<8x1xf32> -> vector<8x128xf32>
    %cst_54 = arith.constant 0.000000e+00 : f32
    %92 = vector.broadcast %cst_54 : f32 to vector<8x128xf32>
    %93 = arith.select %20, %92, %91 : vector<8x128xi1>, vector<8x128xf32>
    %c7 = arith.constant 7 : index
    %c0_55 = arith.constant 0 : index
    %c0_56 = arith.constant 0 : index
    %94 = vector.load %arg6[%c7, %c0_55, %c0_56] : memref<8x32x8xf32, #tpu.memory_space<vmem>>, vector<1x32x8xf32>
    %95 = vector.shape_cast %94 : vector<1x32x8xf32> to vector<32x8xf32>
    %cst_57 = arith.constant dense<0.000000e+00> : vector<32x128xf32>
    %96 = tpu.matmul %95, %93, %cst_57 {dimension_numbers = #tpu.dot_dimension_numbers<[1], [0], [0], [1], [0, 0, 1, 1], [], []>} : vector<32x8xf32>, vector<8x128xf32>, vector<32x128xf32> -> vector<32x128xf32>
    %97 = arith.addf %88, %96 : vector<32x128xf32>
    %98 = vector.broadcast %22 : vector<32x1xf32> to vector<32x128xf32>
    %99 = arith.addf %97, %98 : vector<32x128xf32>
    %cst_58 = arith.constant 0.000000e+00 : f32
    %100 = vector.broadcast %cst_58 : f32 to vector<32x128xf32>
    %101 = arith.maximumf %99, %100 : vector<32x128xf32>
    %c0_59 = arith.constant 0 : index
    %c0_60 = arith.constant 0 : index
    %c0_61 = arith.constant 0 : index
    %102 = vector.load %arg2[%c0_59, %c0_60, %c0_61] : memref<1x32x128xf32, #tpu.memory_space<vmem>>, vector<1x32x128xf32>
    %103 = vector.shape_cast %102 : vector<1x32x128xf32> to vector<32x128xf32>
    %104 = arith.addf %103, %101 : vector<32x128xf32>
    %c0_62 = arith.constant 0 : index
    %c0_63 = arith.constant 0 : index
    %c0_64 = arith.constant 0 : index
    %105 = vector.load %arg8[%c0_62, %c0_63, %c0_64] : memref<1x32x128xf32, #tpu.memory_space<vmem>>, vector<1x32x128xf32>
    %106 = vector.shape_cast %105 : vector<1x32x128xf32> to vector<32x128xf32>
    %107 = vector.shape_cast %104 : vector<32x128xf32> to vector<1x32x128xf32>
    tpu.vector_store %arg8[%c0_62, %c0_63, %c0_64], %107 {strides = array<i32>} : memref<1x32x128xf32, #tpu.memory_space<vmem>>, vector<1x32x128xf32>,
    return
  }
  func.func @transform_0(%arg0: i32, %arg1: i32) -> (i32, i32, i32) {
    %c0_i32 = arith.constant 0 : i32
    %c0_i32_0 = arith.constant 0 : i32
    return %arg0, %c0_i32, %arg1 : i32, i32, i32
  }
  func.func @transform_1(%arg0: i32, %arg1: i32) -> (i32, i32, i32, i32) {
    %c0_i32 = arith.constant 0 : i32
    %c0_i32_0 = arith.constant 0 : i32
    %c0_i32_1 = arith.constant 0 : i32
    return %arg0, %arg1, %c0_i32, %c0_i32_0 : i32, i32, i32, i32
  }
  func.func @transform_2(%arg0: i32, %arg1: i32) -> (i32, i32, i32, i32) {
    %c0_i32 = arith.constant 0 : i32
    %c0_i32_0 = arith.constant 0 : i32
    %c0_i32_1 = arith.constant 0 : i32
    return %arg0, %arg1, %c0_i32, %c0_i32_0 : i32, i32, i32, i32
  }
  func.func @transform_3(%arg0: i32, %arg1: i32) -> (i32, i32) {
    %c0_i32 = arith.constant 0 : i32
    %c0_i32_0 = arith.constant 0 : i32
    %c0_i32_1 = arith.constant 0 : i32
    return %c0_i32, %c0_i32_0 : i32, i32
  }
  func.func @transform_4(%arg0: i32, %arg1: i32) -> (i32, i32, i32) {
    %c0_i32 = arith.constant 0 : i32
    %c0_i32_0 = arith.constant 0 : i32
    %c0_i32_1 = arith.constant 0 : i32
    %c0_i32_2 = arith.constant 0 : i32
    return %c0_i32, %c0_i32_0, %c0_i32_1 : i32, i32, i32
  }
  func.func @transform_5(%arg0: i32, %arg1: i32) -> (i32, i32) {
    %c0_i32 = arith.constant 0 : i32
    %c0_i32_0 = arith.constant 0 : i32
    %c0_i32_1 = arith.constant 0 : i32
    return %c0_i32, %c0_i32_0 : i32, i32
  }
  func.func @transform_6(%arg0: i32, %arg1: i32) -> (i32, i32, i32) {
    %c0_i32 = arith.constant 0 : i32
    %c0_i32_0 = arith.constant 0 : i32
    return %arg0, %c0_i32, %arg1 : i32, i32, i32
  }
}

</mosaic_0001>

<bundles_post_ra>
// kernel: tpu_custom_call.1
= control target key start
LH: loop header
LB: loop body
LE: loop exit
PB: predicated region body
PF: predicated region fallthrough
CT: control target
= control target key end

     0   :  { %s2867_s0 = inlined_call_operand.hbm [shape: f32[2,32,256], index: 0, kind: input, shape index: {}]   ;;  %s2868_s1 = inlined_call_operand.hbm [shape: f32[2,2,8,16], index: 1, kind: input, shape index: {}]   ;;  %s2869_s2 = inlined_call_operand.hbm [shape: f32[2,2,8,16], index: 2, kind: input, shape index: {}]   ;;  %s2870_s3 = inlined_call_operand.hbm [shape: f32[32,32], index: 3, kind: input, shape index: {}]   ;;  %s2871_s4 = inlined_call_operand.hbm [shape: f32[8,32,8], index: 4, kind: input, shape index: {}]   ;;  %s2872_s5 = inlined_call_operand.hbm [shape: f32[32,1], index: 5, kind: input, shape index: {}]   ;;  %s2873_s6 = inlined_call_operand.hbm [shape: f32[2,32,256], index: 6, kind: output, shape index: {}]  }
   0x1   :  { %2906 = sst [smem:[#allocation31_spill]] %s2868_s1 }
   0x2   :  { %2907 = sst [smem:[#allocation32_spill]] %s2870_s3 }
   0x3   :  { %2908 = sst [smem:[#allocation33_spill]] %s2873_s6 }
   0x4   :  { %11 = vsyncpa [#allocation3], 0 }
   0x5   :  { %13 = vsyncpa [#allocation3 + $0x1], 0 }
   0x6   :  { %14 = vsyncpa [#allocation6], 0 }
   0x7   :  { %16 = vsyncpa [#allocation6 + $0x1], 0 }
   0x8   :  { %17 = vsyncpa [#allocation9], 0 }
   0x9   :  { %18 = vsyncpa [#allocation12], 0 }
   0xa   :  { %19 = vsyncpa [#allocation4], 0 }
   0xb   :  { %21 = vsyncpa [#allocation4 + $0x1], 0  ;;  %s2365_s21 = smov 0   ;;  %s2367_s22 = smov 0  }
   0xc   :  { %s2369_s23 = smov 0   ;;  %s2371_s24 = smov 0  }
   0xd   :  { %s2373_s25 = smov 0   ;;  %s2375_s26 = smov 0  }
   0xe   :  { %s2377_s27 = smov 0   ;;  %s2379_s28 = smov 0  }
   0xf LB: > { %2909 = sst [smem:[#allocation19_spill]] %s2282_s21  ;;  %s2406_s29 = sadd.s32 4294967295, %s2310_s28   ;;  %s2310_s28 = sphi %s2379_s28, %s27_s28   ;;  %s2306_s27 = sphi %s2377_s27, %s2971_s27   ;;  %s2302_s26 = sphi %s2375_s26, %s2970_s26   ;;  %s2298_s25 = sphi %s2373_s25, %s2969_s25   ;;  %s2294_s24 = sphi %s2371_s24, %s2968_s24   ;;  %s2290_s23 = sphi %s2369_s23, %s2963_s23   ;;  %s2286_s22 = sphi %s2367_s22, %s2967_s22   ;;  %s2282_s21 = sphi %s2365_s21, %s2966_s21  }
  0x10   : > { %2910 = sst [smem:[#allocation20_spill]] %s2290_s23  ;;  %s1648_s30 = sadd.s32 4294967294, %s2310_s28  }
  0x11   : > { %2911 = sst [smem:[#allocation21_spill]] %s2294_s24  ;;  %p61_p0 = scmp.ne.s32.totalorder %s2286_s22, %s2282_s21 }
  0x12   : > { %2912 = sst [smem:[#allocation22_spill]] %s2298_s25  ;;  %p2874_p1 = scmp.eq.s32.totalorder %s2406_s29, 0 }
  0x13   : > { %2913 = sst [smem:[#allocation23_spill]] %s2310_s28  ;;  %p212_p3 = scmp.eq.s32.totalorder %s1648_s30, 3 }
  0x14   : > { %2914 = sst [smem:[#allocation24_spill]] %s2406_s29  ;;  %p2415_p4 = por %p2874_p1, %p61_p0 }
  0x15   : > { %p1649_p5 = scmp.ge.s32.totalorder %s2310_s28, 1  ;;  %p2420_p6 = por %p212_p3, %p61_p0 }
  0x16   : > { %s2915_s7 = scalar_select %p2415_p4, 1, 0 }
  0x17   : > { %s2917_s8 = scalar_select %p2420_p6, 1, 0 }
  0x18   : > { %2916 = sst [smem:[#allocation25_spill]] %s2915_s7  ;;  %p219_p7 = scmp.lt.s32.totalorder %s2310_s28, 5 }
  0x19   : > { %2918 = sst [smem:[#allocation26_spill]] %s2917_s8  ;;  %s2312_s10 = smov [#allocation8]  }
  0x1a   : > { %p2425_p8 = pnand %p1649_p5, %p219_p7  ;;  %s231_s11 = sshll.u32 %s2312_s10, 4  ;;  %s232_s11 = int_to_ptr.vmem [resolvable:$true] %s231_s11 }
  0x1b   : > { %s2921_s3 = sld [smem:[#allocation32_spill]] }
  0x1c   : > { %s2919_s9 = scalar_select %p2425_p8, 1, 0 }
  0x1d   : > { %p1914_p9 = pneg %p2425_p8 }
  0x1f   : > { %p2433_p10 = pnand %p1914_p9, %p2874_p1 }
  0x21   : > { %s2920_s12 = scalar_select %p2433_p10, 1, 0 }
  0x22   : > { %s2026_s15 = scalar_lea.hbm %s2921_s3, 512  ;;  %p2445_p12 = pneg %p2433_p10 }
  0x23   : > { %p2027_p11 = scmp.ne.s32.totalorder %s2921_s3, %s2026_s15  ;;  %p2033_p3 = scmp.lt.u32.totalorder %s2026_s15, %s2921_s3 }
  0x24   : > { %s2922_s18 = scalar_select %p2445_p12, 1, 0 }
  0x25   : > { %p2029_p13 = pnand %p2445_p12, %p2027_p11 }
  0x27   : > { %p2030_p0 = pneg %p2029_p13 }
  0x29   : > { %p2035_p5 = pnand %p2033_p3, %p2030_p0 }
  0x2b   : > { %2038 = shalt.err (!%p2035_p5)
}
  0x2c   : > { %s2039_s30 = scalar_lea.vmem %s232_s11, 512  ;;  %p2047_p2 = scmp.lt.s32.totalorder %s232_s11, %s232_s11 }
  0x2d   : > { %p2040_p7 = scmp.ne.s32.totalorder %s232_s11, %s2039_s30  ;;  %p2048_p6 = scmp.lt.s32.totalorder %s2039_s30, %s2039_s30 }
  0x2f   : > { %p2042_p9 = pnand %p2040_p7, %p2445_p12  ;;  %p2049_p4 = por %p2048_p6, %p2047_p2 }
  0x31   : > { %p2043_p1 = pneg %p2042_p9 }
  0x33   : > { %p2050_p8 = pnand %p2049_p4, %p2043_p1 }
  0x35   : > { %2053 = shalt.err (!%p2050_p8)
}
  0x36   : > { %s2877_s10 = smov 128   ;;  %s2879_s13 = smov 8  }
  0x37   : > { %1917 = dma.hbm_to_vmem [thread:$0]  (!%p2433_p10), %s2921_s3, 512, %s232_s11, [#allocation9], %s2877_s10, %s2877_s10, %s2879_s13  }
  0x38   : > { %s36_s16 = sadd.s32 1, %s2302_s26  ;;  %s39_s17 = sadd.s32 1, %s2306_s27 }
  0x39   : > { %p37_p1 = scmp.ge.s32.totalorder %s36_s16, 2  ;;  %s48_s19 = sadd.s32 1, %s2290_s23 }
  0x3a   : > { %p55_p2 = scmp.ne.s32.totalorder %s2290_s23, %s2286_s22  ;;  %p56_p4 = scmp.eq.s32.totalorder %s2310_s28, 0 }
  0x3b   : > { %s2973_s16 = smov (%p37_p1, %s36_s16), 0  ;;  %s2975_s17 = smov (!%p37_p1, %s39_s17), %s2306_s27 }
  0x3c   : > { %2923 = sst [smem:[#allocation27_spill]] %s2973_s16  ;;  %s44_s20 = ssub.s32 %s2302_s26, %s2973_s16 }
  0x3d   : > { %p41_p6 = scmp.ge.s32.totalorder %s2975_s17, 2  ;;  %p2924_p8 = scmp.eq.s32.totalorder %s2406_s29, 3 }
  0x3e   : > { %p57_p13 = por %p56_p4, %p55_p2  ;;  %p1941_p0 = scmp.lt.s32.totalorder %s2310_s28, 4 }
  0x3f   : > { %p2477_p11 = por %p2924_p8, %p55_p2  ;;  %s2977_s17 = smov (%p41_p6, %s2975_s17), 0 }
  0x40   : > { %2927 = sst [smem:[#allocation29_spill]] %s2977_s17  ;;  %s2485_s11 = sand.u32 1, %s2290_s23  }
  0x41   : > { %s2925_s30 = scalar_select %p2477_p11, 1, 0 }
  0x42   : > { %p2487_p3 = pnand %p1941_p0, %p57_p13  ;;  %s43_s15 = ssub.s32 %s2306_s27, %s2977_s17 }
  0x43   : > { %2926 = sst [smem:[#allocation28_spill]] %s2925_s30  ;;  %s45_s10 = sor.u32 %s44_s20, %s43_s15 }
  0x44   : > { %s2928_s14 = scalar_select %p2487_p3, 1, 0 }
  0x45   : > { %s1654_s13 = sshll.u32 %s2485_s11, 5  ;;  %p46_p5 = scmp.eq.s32.totalorder %s45_s10, 0 }
  0x46   : > { %s275_s3 = scalar_lea.vmem [#allocation2], %s1654_s13  ;;  %s293_s21 = sand.u32 1, %s2310_s28  }
  0x47   : > { %s283_s16 = sshll.u32 %s275_s3, 4  ;;  %s2888_s6 = sshll.u32 %s2485_s11, 3  ;;  %s2497_s16 = int_to_ptr.vmem [resolvable:$true] %s283_s16 }
  0x48   : > { %s2495_s8 = scalar_select %p46_p5, %s2290_s23, %s48_s19  }
  0x49   : > { %s1658_s30 = sshll.u32 %s2306_s27, 1  ;;  %s297_s25 = scalar_lea.vmem [#allocation5], %s2888_s6 }
  0x4a   : > { %2929 = sst [smem:[#allocation30_spill]] %s2495_s8  ;;  %s2503_s24 = sadd.s32 %s2302_s26, %s1658_s30 }
  0x4b   : > { %s306_s17 = sshll.u32 %s297_s25, 4  ;;  %s2889_s20 = sshll.u32 %s2503_s24, 7  ;;  %s2508_s17 = int_to_ptr.vmem [resolvable:$true] %s306_s17 }
  0x4c   : > { %s2930_s1 = sld [smem:[#allocation31_spill]]  ;;  %s2517_s19 = scalar_lea.sflag [#allocation6], %s293_s21 }
  0x4d   : > { %p2523_p9 = pneg %p2487_p3 }
  0x4f   : > { %s2931_s25 = scalar_select %p2523_p9, 1, 0 }
  0x52   : > { %s2515_s13 = scalar_lea.hbm %s2930_s1, %s2889_s20  ;;  %s2059_s3 = scalar_lea.hbm %s2930_s1, 512 }
  0x53   : > { %s2054_s30 = scalar_lea.hbm %s2515_s13, 128  ;;  %p2060_p4 = scmp.lt.u32.totalorder %s2515_s13, %s2930_s1 }
  0x54   : > { %p2055_p7 = scmp.ne.s32.totalorder %s2515_s13, %s2054_s30  ;;  %p2061_p6 = scmp.lt.u32.totalorder %s2059_s3, %s2054_s30 }
  0x55   : > { %p2063_p13 = scmp.lt.u32.totalorder %s2054_s30, %s2515_s13 }
  0x56   : > { %p2057_p1 = pnand %p2523_p9, %p2055_p7  ;;  %p2062_p8 = por %p2061_p6, %p2060_p4 }
  0x58   : > { %p2058_p2 = pneg %p2057_p1  ;;  %p2064_p0 = por %p2063_p13, %p2062_p8 }
  0x5a   : > { %p2065_p5 = pnand %p2064_p0, %p2058_p2 }
  0x5c   : > { %2068 = shalt.err (!%p2065_p5)
}
  0x5d   : > { %s2069_s21 = scalar_lea.vmem %s2508_s17, 128  ;;  %s2315_s15 = smov [#allocation5]  }
  0x5e   : > { %p2070_p7 = scmp.ne.s32.totalorder %s2508_s17, %s2069_s21  ;;  %s2074_s10 = sshll.u32 %s2315_s15, 4  ;;  %s2075_s10 = int_to_ptr.vmem [resolvable:$false] %s2074_s10 }
  0x5f   : > { %s2076_s6 = scalar_lea.vmem %s2075_s10, 256  ;;  %p2077_p10 = scmp.lt.s32.totalorder %s2508_s17, %s2075_s10 }
  0x60   : > { %p2072_p1 = pnand %p2070_p7, %p2523_p9  ;;  %p2078_p12 = scmp.lt.s32.totalorder %s2076_s6, %s2069_s21 }
  0x62   : > { %p2073_p11 = pneg %p2072_p1  ;;  %p2079_p4 = por %p2078_p12, %p2077_p10 }
  0x64   : > { %p2080_p6 = pnand %p2079_p4, %p2073_p11 }
  0x66   : > { %2083 = shalt.err (!%p2080_p6)
}
  0x67   : > { %1930 = dma.hbm_to_vmem [thread:$0]  (!%p2487_p3), %s2515_s13, 128, %s2508_s17, %s2517_s19  }
  0x68   : > { %s2932_s20 = sshll.u32 %s2503_s24, 7  ;;  %s2316_s1 = smov [#allocation10]  }
  0x69   : > { %s2552_s15 = scalar_lea.hbm %s2869_s2, %s2932_s20  ;;  %s244_s10 = sshll.u32 %s2316_s1, 4  ;;  %s245_s10 = int_to_ptr.vmem [resolvable:$true] %s244_s10 }
  0x6a   : > { %s2317_s21 = smov [#allocation11]   ;;  %s2084_s28 = scalar_lea.hbm %s2871_s4, 4096 }
  0x6b   : > { %s257_s6 = sshll.u32 %s2317_s21, 4  ;;  %p2085_p10 = scmp.ne.s32.totalorder %s2871_s4, %s2084_s28  ;;  %s258_s6 = int_to_ptr.vmem [resolvable:$true] %s257_s6 }
  0x6c   : > { %p2933_p12 = scmp.ne.s32.totalorder %s2922_s18, 0  ;;  %p2091_p8 = scmp.lt.u32.totalorder %s2084_s28, %s2871_s4 }
  0x6e   : > { %p2087_p11 = pnand %p2085_p10, %p2933_p12 }
  0x70   : > { %p2088_p2 = pneg %p2087_p11 }
  0x72   : > { %p2093_p13 = pnand %p2091_p8, %p2088_p2 }
  0x74   : > { %2096 = shalt.err (!%p2093_p13)
}
  0x75   : > { %s2097_s1 = scalar_lea.vmem %s245_s10, 4096  ;;  %p2105_p1 = scmp.lt.s32.totalorder %s245_s10, %s245_s10 }
  0x76   : > { %p2098_p0 = scmp.ne.s32.totalorder %s245_s10, %s2097_s1  ;;  %p2106_p4 = scmp.lt.s32.totalorder %s2097_s1, %s2097_s1 }
  0x78   : > { %p2100_p5 = pnand %p2098_p0, %p2933_p12  ;;  %p2107_p6 = por %p2106_p4, %p2105_p1 }
  0x7a   : > { %p2101_p7 = pneg %p2100_p5 }
  0x7c   : > { %p2108_p3 = pnand %p2107_p6, %p2101_p7 }
  0x7e   : > { %2111 = shalt.err (!%p2108_p3)
}
  0x7f   : > { %p2934_p10 = scmp.ne.s32.totalorder %s2920_s12, 0  ;;  %s2935_s23 = smov 8  }
  0x80   : > { %s2936_s29 = smov 128   ;;  %s1655_s8 = sshll.u32 %s2306_s27, 3 }
  0x81   : > { %1920 = dma.hbm_to_vmem [thread:$0]  (!%p2934_p10), %s2871_s4, 4096, %s245_s10, [#allocation9], %s2936_s29, %s2936_s29, %s2935_s23  }
  0x82   : > { %s2112_s30 = scalar_lea.hbm %s2872_s5, 512 }
  0x83   : > { %p2113_p3 = scmp.ne.s32.totalorder %s2872_s5, %s2112_s30  ;;  %p2119_p8 = scmp.lt.u32.totalorder %s2112_s30, %s2872_s5 }
  0x85   : > { %p2115_p11 = pnand %p2113_p3, %p2933_p12 }
  0x87   : > { %p2116_p2 = pneg %p2115_p11 }
  0x89   : > { %p2121_p13 = pnand %p2119_p8, %p2116_p2 }
  0x8b   : > { %2124 = shalt.err (!%p2121_p13)
}
  0x8c   : > { %s2125_s10 = scalar_lea.vmem %s258_s6, 512  ;;  %p2133_p1 = scmp.lt.s32.totalorder %s258_s6, %s258_s6 }
  0x8d   : > { %p2126_p0 = scmp.ne.s32.totalorder %s258_s6, %s2125_s10  ;;  %p2134_p4 = scmp.lt.s32.totalorder %s2125_s10, %s2125_s10 }
  0x8f   : > { %p2128_p5 = pnand %p2126_p0, %p2933_p12  ;;  %p2135_p6 = por %p2134_p4, %p2133_p1 }
  0x91   : > { %p2129_p7 = pneg %p2128_p5 }
  0x93   : > { %p2136_p9 = pnand %p2135_p6, %p2129_p7 }
  0x95   : > { %2139 = shalt.err (!%p2136_p9)
}
  0x96   : > { %1923 = dma.hbm_to_vmem [thread:$0]  (!%p2934_p10), %s2872_s5, 512, %s258_s6, [#allocation12], %s2936_s29, %s2936_s29, %s2935_s23  }
  0x97   : > { %s280_s18 = sadd.s32 %s2302_s26, %s1655_s8  ;;  %s2937_s13 = sshll.u32 %s2485_s11, 3 }
  0x98   : > { %s1656_s28 = sshll.u32 %s280_s18, 7  ;;  %s317_s20 = scalar_lea.vmem [#allocation7], %s2937_s13 }
  0x99   : > { %s326_s30 = sshll.u32 %s317_s20, 4  ;;  %s2603_s12 = scalar_lea.hbm %s2867_s0, %s1656_s28  ;;  %s2605_s30 = int_to_ptr.vmem [resolvable:$true] %s326_s30 }
  0x9a   : > { %s272_s24 = scalar_lea.sflag [#allocation3], %s2485_s11  ;;  %s2140_s17 = scalar_lea.hbm %s2603_s12, 512 }
  0x9b   : > { %p2141_p9 = scmp.ne.s32.totalorder %s2603_s12, %s2140_s17  ;;  %p2938_p12 = scmp.ne.s32.totalorder %s2931_s25, 0 }
  0x9c   : > { %s2145_s10 = scalar_lea.hbm %s2867_s0, 2048  ;;  %p2146_p11 = scmp.lt.u32.totalorder %s2603_s12, %s2867_s0 }
  0x9d   : > { %p2143_p10 = pnand %p2141_p9, %p2938_p12  ;;  %p2147_p2 = scmp.lt.u32.totalorder %s2145_s10, %s2140_s17 }
  0x9e   : > { %p2149_p13 = scmp.lt.u32.totalorder %s2140_s17, %s2603_s12 }
  0x9f   : > { %p2144_p3 = pneg %p2143_p10  ;;  %p2148_p8 = por %p2147_p2, %p2146_p11 }
  0xa1   : > { %p2150_p0 = por %p2149_p13, %p2148_p8 }
  0xa3   : > { %p2151_p5 = pnand %p2150_p0, %p2144_p3 }
  0xa5   : > { %2154 = shalt.err (!%p2151_p5)
}
  0xa6   : > { %s2155_s18 = scalar_lea.vmem %s2497_s16, 512  ;;  %s2318_s28 = smov [#allocation2]  }
  0xa7   : > { %p2156_p7 = scmp.ne.s32.totalorder %s2497_s16, %s2155_s18  ;;  %s2160_s13 = sshll.u32 %s2318_s28, 4  ;;  %s2161_s13 = int_to_ptr.vmem [resolvable:$false] %s2160_s13 }
  0xa8   : > { %s2162_s20 = scalar_lea.vmem %s2161_s13, 1024  ;;  %p2163_p6 = scmp.lt.s32.totalorder %s2497_s16, %s2161_s13 }
  0xa9   : > { %p2158_p1 = pnand %p2156_p7, %p2938_p12  ;;  %p2164_p9 = scmp.lt.s32.totalorder %s2162_s20, %s2155_s18 }
  0xab   : > { %p2159_p4 = pneg %p2158_p1  ;;  %p2165_p10 = por %p2164_p9, %p2163_p6 }
  0xad   : > { %p2166_p11 = pnand %p2165_p10, %p2159_p4 }
  0xaf   : > { %2169 = shalt.err (!%p2166_p11)
}
  0xb0   : > { %s2319_s3 = smov 256   ;;  %p2939_p3 = scmp.ne.s32.totalorder %s2928_s14, 0 }
  0xb1   : > { %s2170_s21 = scalar_lea.hbm %s2552_s15, 128  ;;  %s2175_s8 = scalar_lea.hbm %s2869_s2, 512 }
  0xb2   : > { %1927 = dma.hbm_to_vmem [thread:$0]  (!%p2939_p3), %s2603_s12, 512, %s2497_s16, %s272_s24, %s2319_s3, %s2936_s29, %s2935_s23  }
  0xb3   : > { %p2171_p2 = scmp.ne.s32.totalorder %s2552_s15, %s2170_s21  ;;  %p2176_p0 = scmp.lt.u32.totalorder %s2552_s15, %s2869_s2 }
  0xb4   : > { %p2177_p5 = scmp.lt.u32.totalorder %s2175_s8, %s2170_s21  ;;  %p2179_p1 = scmp.lt.u32.totalorder %s2170_s21, %s2552_s15 }
  0xb5   : > { %p2173_p8 = pnand %p2171_p2, %p2938_p12 }
  0xb6   : > { %p2178_p7 = por %p2177_p5, %p2176_p0 }
  0xb7   : > { %p2174_p13 = pneg %p2173_p8 }
  0xb8   : > { %p2180_p4 = por %p2179_p1, %p2178_p7 }
  0xba   : > { %p2181_p6 = pnand %p2180_p4, %p2174_p13 }
  0xbc   : > { %2184 = shalt.err (!%p2181_p6)
}
  0xbd   : > { %s2185_s16 = scalar_lea.vmem %s2605_s30, 128  ;;  %s2320_s11 = smov [#allocation7]  }
  0xbe   : > { %p2186_p9 = scmp.ne.s32.totalorder %s2605_s30, %s2185_s16  ;;  %s2190_s23 = sshll.u32 %s2320_s11, 4  ;;  %s2191_s23 = int_to_ptr.vmem [resolvable:$false] %s2190_s23 }
  0xbf   : > { %s2192_s29 = scalar_lea.vmem %s2191_s23, 256  ;;  %p2193_p2 = scmp.lt.s32.totalorder %s2605_s30, %s2191_s23 }
  0xc0   : > { %p2188_p10 = pnand %p2186_p9, %p2938_p12  ;;  %p2194_p8 = scmp.lt.s32.totalorder %s2192_s29, %s2185_s16 }
  0xc2   : > { %p2189_p11 = pneg %p2188_p10  ;;  %p2195_p0 = por %p2194_p8, %p2193_p2 }
  0xc4   : > { %p2196_p5 = pnand %p2195_p0, %p2189_p11 }
  0xc6   : > { %2199 = shalt.err (!%p2196_p5)
}
  0xc7   : > { %1933 = dma.hbm_to_vmem [thread:$0]  (!%p2939_p3), %s2552_s15, 128, %s2605_s30, %s2517_s19  }
  0xc8   : > { %p2940_p13 = scmp.ne.s32.totalorder %s2919_s9, 0 }
  0xc9   : > { %s2941_s25 = sld [smem:[#allocation25_spill]] (!%p2940_p13)  ;;  %s2658_s12 = sand.u32 (!%p2940_p13), 1, %s2286_s22  }
  0xca   : > { %335 = sbr.rel (%p2940_p13) target bundleno = 733 (0x2dd), region = 44  ;;  %s1664_s24 = sshll.u32 (!%p2940_p13), %s2658_s12, 5 }
  0xcb   : > { %s338_s7 = scalar_lea.sflag (!%p2940_p13), [#allocation3], %s2658_s12  ;;  %s2664_s18 = scalar_lea.vmem (!%p2940_p13), [#allocation2], %s1664_s24 }
  0xcf   : > { %p2942_p12 = scmp.ne.s32.totalorder (!%p2940_p13), %s2941_s25, 0 }
  0xd1   : > { %2261 = dma.done.wait (%p2942_p12), %s338_s7, 512  }
  0xd2   : > { %2263 = vsyncadd (%p2942_p12), %s338_s7, 4294966784  ;;  %s2943_s14 = sld [smem:[#allocation24_spill]]  ;;  %s1665_s19 = sshll.u32 %s2658_s12, 3 }
  0xd3   : > { %s350_s30 = scalar_lea.vmem [#allocation5], %s1665_s19 }
  0xd8   : > { %s346_s9 = sand.u32 1, %s2943_s14  }
  0xd9   : > { %s347_s15 = scalar_lea.sflag [#allocation6], %s346_s9 }
  0xda   : > { %2265 = dma.done.wait (%p2942_p12), %s347_s15, 256  }
  0xdb   : > { %2267 = vsyncadd (%p2942_p12), %s347_s15, 4294967040  ;;  %s359_s28 = scalar_lea.vmem [#allocation7], %s1665_s19  ;;  %p2944_p3 = scmp.eq.s32.totalorder %s2943_s14, 0 }
  0xdd   : > { %2269 = dma.done.wait (%p2944_p3), [#allocation9], 4608   ;;  %p2945_p7 = pmov %p2944_p3 }
  0xde   : > { %p2946_p1 = pmov %p2944_p3 }
  0xdf   : > { %2271 = vsyncadd (%p2945_p7), [#allocation9], 4294962688 }
  0xe0   : > { %2273 = dma.done.wait (%p2946_p1), [#allocation12], 512   ;;  %p2947_p4 = pmov %p2946_p1 }
  0xe1   : > { %vm467_vm0 = vcmask 64512   ;;  %v2685_v0 = vld [vmem:[%s2664_s18] sm:$0xff]  ;;  %v446_v1 = vld [vmem:[%s359_s28] sm:$0xff]  ;;  %s2321_s13 = smov 16   ;;  %s2322_s20 = smov 112   ;;  %v410_v4 = vlaneseq  ;;  %vm444_vm1 = vcmask 130048  }
  0xe2   : > { %2275 = vsyncadd (%p2947_p4), [#allocation12], 4294966784  ;;  %441 = vrot.lane.b32.xlu0 %v2685_v0, %s2321_s13  ;;  %451 = vrot.lane.b32.xlu1 %v446_v1, %s2322_s20  ;;  %v887_v2 = vld [vmem:[#allocation10 + $0x60] sm:$0xff]  ;;  %s2323_s3 = smov 1   ;;  %vm454_vm2 = vcmask 916480   ;;  %s2324_s21 = smov 127  }
  0xe3   : > { %1814 = vmatprep.mubr.msk.f32.mxu0 %vm467_vm0, %v887_v2  ;;  %v463_v3 = vld [vmem:[#allocation10] sm:$0xff]  ;;  %v411_v7 = vand.u32 127, %v410_v4  ;;  %vm460_vm3 = vcmask 7168   ;;  %v888_v16 = vld [vmem:[#allocation10 + $0x68] sm:$0xff]  ;;  %v2325_v20 = vmov 0   ;;  %v432_v21 = vld [vmem:[#allocation11 + $0x10] sm:$0xff] }
  0xe4   : > { %1776 = vmatprep.mubr.msk.f32.mxu1 %vm467_vm0, %v463_v3  ;;  %v439_v5 = vld [vmem:[%s350_s30] sm:$0xff]  ;;  %2024 = vset.pattern.permute.xlu1 %v2325_v20  ;;  %v433_v22 = vld [vmem:[#allocation11 + $0x18] sm:$0xff]  ;;  %v2720_v24 = vld [vmem:[%s2664_s18 + $0x10] sm:$0xff]  ;;  %vm772_vm5 = vcmask 1039360   ;;  %vm565_vm7 = vcmask 261120   ;;  %s2952_s17 = sld [smem:[#allocation22_spill]] }
  0xe5   : > { %v416_v11 = vand.u32 15, %v411_v7  ;;  %v998_v17 = vld [vmem:[#allocation10 + $0x80] sm:$0xff]  ;;  %v431_v19 = vld [vmem:[#allocation11 + $0x8] sm:$0xff]  ;;  %2025 = vset.pattern.permute.xlu0 %v2325_v20  ;;  %v2723_v25 = vld [vmem:[%s2664_s18 + $0x18] sm:$0xff]  ;;  %s2953_s6 = sld [smem:[#allocation21_spill]]  ;;  %s409_s1 = scalar_lea.vmem [#allocation13], %s1664_s24 }
  0xe6   : > { %447 = vrot.lane.b32.xlu0 %v2685_v0, %s2322_s20  ;;  %v430_v18 = vld [vmem:[#allocation11] sm:$0xff]  ;;  %v2717_v23 = vld [vmem:[%s2664_s18 + $0x8] sm:$0xff]  ;;  %v465_v30 = vld [vmem:[#allocation10 + $0x10] sm:$0xff]  ;;  %v1856_v31 = vpack.c.bf16 %v2723_v25, %v2720_v24  ;;  %s2954_s16 = sld [smem:[#allocation28_spill]]  ;;  %s1483_s11 = sshll.u32 %s409_s1, 4  ;;  %s2806_s11 = int_to_ptr.vmem [resolvable:$true] %s1483_s11 }
  0xe7   : > { %vm2699_vm4 = vcmp.ne.s32.totalorder %v416_v11, 0  ;;  %v1852_v27 = vpack.c.bf16 %v2717_v23, %v2685_v0  ;;  %v464_v29 = vld [vmem:[#allocation10 + $0x8] sm:$0xff]  ;;  %vm2734_vm6 = vcmp.ne.s32.totalorder %v416_v11, 15  ;;  %v466_v36 = vld [vmem:[#allocation10 + $0x18] sm:$0xff]  ;;  %v426_v39 = vld [vmem:[#allocation8] sm:$0xff]  ;;  %s2955_s24 = sld [smem:[#allocation33_spill]] }
  0xe8   : > { %v999_v37 = vld [vmem:[#allocation10 + $0x88] sm:$0xff]  ;;  %v1000_v40 = vld [vmem:[#allocation10 + $0x90] sm:$0xff]  ;;  %v1001_v43 = vld [vmem:[#allocation10 + $0x98] sm:$0xff]  ;;  %s1469_s14 = scalar_lea.sflag [#allocation4], %s2658_s12  ;;  %s2200_s9 = scalar_lea.vmem %s2806_s11, 512 }
  0xe9   : > { %v427_v41 = vld [vmem:[#allocation8 + $0x8] sm:$0xff]  ;;  %v428_v44 = vld [vmem:[#allocation8 + $0x10] sm:$0xff]  ;;  %v1110_v45 = vld [vmem:[#allocation10 + $0xa0] sm:$0xff]  ;;  %p2201_p6 = scmp.ne.s32.totalorder %s2806_s11, %s2200_s9  ;;  %s2326_s19 = smov [#allocation13]  }
  0xea   : > { %881 = vrot.lane.b32.xlu0 %v2685_v0, %s2323_s3  ;;  %v429_v48 = vld [vmem:[#allocation8 + $0x18] sm:$0xff]  ;;  %v1111_v49 = vld [vmem:[#allocation10 + $0xa8] sm:$0xff]  ;;  %v664_v50 = vld [vmem:[#allocation10 + $0x20] sm:$0xff]  ;;  %s1720_s8 = sshll.u32 %s2952_s17, 3  ;;  %s2204_s15 = sshll.u32 %s2326_s19, 4  ;;  %s2205_s15 = int_to_ptr.vmem [resolvable:$false] %s2204_s15 }
  0xeb   : > { %v1112_v51 = vld [vmem:[#allocation10 + $0xb0] sm:$0xff]  ;;  %v665_v53 = vld [vmem:[#allocation10 + $0x28] sm:$0xff]  ;;  %v1113_v54 = vld [vmem:[#allocation10 + $0xb8] sm:$0xff]  ;;  %s1480_s10 = sadd.s32 %s2953_s6, %s1720_s8  ;;  %s2206_s30 = scalar_lea.vmem %s2205_s15, 1024 }
  0xec   : > { %v666_v55 = vld [vmem:[#allocation10 + $0x30] sm:$0xff]  ;;  %v1216_v56 = vld [vmem:[#allocation10 + $0xc0] sm:$0xff]  ;;  %v667_v57 = vld [vmem:[#allocation10 + $0x38] sm:$0xff]  ;;  %s1721_s23 = sshll.u32 %s1480_s10, 7  ;;  %p2957_p9 = scmp.ne.s32.totalorder %s2954_s16, 0 }
  0xed   : > { %v1217_v58 = vld [vmem:[#allocation10 + $0xc8] sm:$0xff]  ;;  %v776_v59 = vld [vmem:[#allocation10 + $0x40] sm:$0xff]  ;;  %v1218_v60 = vld [vmem:[#allocation10 + $0xd0] sm:$0xff]  ;;  %s2956_s7 = smov %s2955_s24  ;;  %s2812_s18 = scalar_lea.hbm %s2955_s24, %s1721_s23 }
  0xee   : > { %v777_v61 = vld [vmem:[#allocation10 + $0x48] sm:$0xff]  ;;  %v1219_v62 = vld [vmem:[#allocation10 + $0xd8] sm:$0xff]  ;;  %v778_v63 = vld [vmem:[#allocation10 + $0x50] sm:$0xff]  ;;  %p2202_p10 = pnand %p2201_p6, %p2957_p9  ;;  %p2207_p2 = scmp.lt.s32.totalorder %s2806_s11, %s2205_s15 }
  0xef   : > { %v1327_v1 = vld [vmem:[#allocation10 + $0xe0] sm:$0xff]  ;;  %v779_v2 = vld [vmem:[#allocation10 + $0x58] sm:$0xff]  ;;  %v1328_v3 = vld [vmem:[#allocation10 + $0xe8] sm:$0xff]  ;;  %p2208_p8 = scmp.lt.s32.totalorder %s2206_s30, %s2200_s9 }
  0xf0   : > { %v889_v4 = vld [vmem:[#allocation10 + $0x70] sm:$0xff]  ;;  %v890_v7 = vld [vmem:[#allocation10 + $0x78] sm:$0xff]  ;;  %p2203_p11 = pneg %p2202_p10 }
  0xf1   : > { %p2209_p0 = por %p2208_p8, %p2207_p2 }
  0xf3   : > { %p2210_p5 = pnand %p2209_p0, %p2203_p11 }
 0x154   : > { %v442_v6 = vpop.permute.xlu0 %441  ;;  %v452_v9 = vpop.permute.xlu1 %451 }
 0x155   : > { %v2692_v8 = vsel %vm444_vm1, %v439_v5, %v442_v6  ;;  %v1329_v5 = vld [vmem:[#allocation10 + $0xf0] sm:$0xff]  ;;  %v1330_v6 = vld [vmem:[#allocation10 + $0xf8] sm:$0xff] }
 0x156   : > { %457 = vrot.lane.b32.xlu1 %v2692_v8, %s2323_s3 }
 0x158   : > { %v448_v10 = vpop.permute.xlu0 %447 }
 0x159   : > { %v2695_v12 = vsel %vm454_vm2, %v448_v10, %v452_v9 }
 0x15a   : > { %992 = vrot.lane.b32.xlu1 %v2685_v0, %s2324_s21  ;;  %1104 = vrot.lane.b32.xlu0 %v2695_v12, %s2323_s3 }
 0x15c   : > { %v882_v13 = vpop.permute.xlu0 %881 }
 0x15d   : > { %v2704_v15 = vsel %vm460_vm3, 0.0, %v882_v13 }
 0x15e   : > { %769 = vrot.lane.b32.xlu1 %v2692_v8, %s2324_s21  ;;  %1321 = vrot.lane.b32.xlu0 %v2695_v12, %s2324_s21 }
 0x15f   : > { %1812 = vmatprep.subr.msk.mxu0 %vm2699_vm4, %v2704_v15 }
 0x160   : > { %1813 = vmatpush3.msk.msra.mxu0 %vm2699_vm4, %v2704_v15 }
 0x161   : > { %1815 = vmatmul.mubr.msk.f32.vlgmr.msra.gmra.mrb[0].mxu0 %vm467_vm0, %v888_v16 }
 0x162   : > { %1822 = vmatprep.mubr.msk.f32.mxu0 %vm467_vm0, %v998_v17  ;;  %1434 = vperm.xlu1 %2024, %v430_v18  }
 0x163   : > { %1439 = vperm.xlu0 %2025, %v431_v19  }
 0x166   : > { %1444 = vperm.xlu1 %2024, %v432_v21  }
 0x16a   : > { %1449 = vperm.xlu1 %2024, %v433_v22  }
 0x1c8   : > { %v458_v26 = vpop.permute.xlu1 %457 }
 0x1c9   : > { %v461_v28 = vsel %vm460_vm3, 0.0, %v458_v26 }
 0x1ca   : > { %1774 = vmatprep.subr.msk.mxu1 %vm2699_vm4, %v461_v28 }
 0x1cb   : > { %1775 = vmatpush3.msk.msra.mxu1 %vm2699_vm4, %v461_v28 }
 0x1cc   : > { %1777 = vmatmul.mubr.msk.f32.vlgmr.msra.gmra.mrb[0].mxu1 %vm467_vm0, %v464_v29  ;;  %v993_v33 = vpop.permute.xlu1 %992  ;;  %1853 = vmatprep.subr.bf16.mxu1 %v1852_v27  ;;  %v1105_v34 = vpop.permute.xlu0 %1104 }
 0x1cd   : > { %v995_v35 = vsel %vm772_vm5, %v993_v33, 0.0  ;;  %1855 = vmatpush3.bf16.msra.mxu1 %v1852_v27  ;;  %1779 = vmatprep.mubr.msk.f32.mxu1 %vm467_vm0, %v465_v30  ;;  %v1107_v38 = vsel %vm460_vm3, 0.0, %v1105_v34 }
 0x1ce   : > { %1820 = vmatprep.subr.msk.mxu0 %vm2734_vm6, %v995_v35  ;;  %1857 = vmatprep.subr.bf16.mxu1 %v1856_v31 }
 0x1cf   : > { %1821 = vmatpush3.msk.msra.mxu0 %vm2734_vm6, %v995_v35 }
 0x1d0   : > { %1780 = vmatmul.mubr.msk.f32.gmra.mrb[2].mxu1 %vm467_vm0, %v466_v36  ;;  %1823 = vmatmul.mubr.msk.f32.vlgmr.msra.gmra.mrb[0].mxu0 %vm467_vm0, %v999_v37  ;;  %v770_v42 = vpop.permute.xlu1 %769  ;;  %v1322_v47 = vpop.permute.xlu0 %1321 }
 0x1d1   : > { %1828 = vmatprep.subr.msk.mxu0 %vm2699_vm4, %v1107_v38  ;;  %1859 = vmatpush3.bf16.msra.mxu1 %v1856_v31  ;;  %v773_v46 = vsel %vm772_vm5, %v770_v42, 0.0  ;;  %v1324_v52 = vsel %vm772_vm5, %v1322_v47, 0.0 }
 0x1d2   : > { %1829 = vmatpush3.msk.msra.mxu0 %vm2699_vm4, %v1107_v38  ;;  %1796 = vmatprep.subr.mxu1 %v2692_v8 }
 0x1d3   : > { %1836 = vmatprep.subr.mxu0 %v2695_v12  ;;  %1790 = vmatprep.mubr.msk.f32.mxu1 %vm565_vm7, %v426_v39 }
 0x1d4   : > { %1825 = vmatprep.mubr.msk.f32.mxu0 %vm467_vm0, %v1000_v40  ;;  %1791 = vmatmul.mubr.msk.f32.vlgmr.msra.gmra.mrb[0].mxu1 %vm565_vm7, %v427_v41 }
 0x1d5   : > { %1826 = vmatmul.mubr.msk.f32.gmra.mrb[2].mxu0 %vm467_vm0, %v1001_v43  ;;  %1797 = vmatpush3.msra.mxu1 %v2692_v8 }
 0x1d6   : > { %1804 = vmatprep.subr.msk.mxu1 %vm2734_vm6, %v773_v46  ;;  %1793 = vmatprep.mubr.msk.f32.mxu1 %vm565_vm7, %v428_v44 }
 0x1d7   : > { %1830 = vmatprep.mubr.msk.f32.mxu0 %vm467_vm0, %v1110_v45 }
 0x1d8   : > { %1794 = vmatmul.mubr.msk.f32.gmra.mrb[2].mxu1 %vm565_vm7, %v429_v48 }
 0x1d9   : > { %1831 = vmatmul.mubr.msk.f32.vlgmr.msra.gmra.mrb[0].mxu0 %vm467_vm0, %v1111_v49  ;;  %1798 = vmatprep.mubr.msk.f32.mxu1 %vm467_vm0, %v664_v50 }
 0x1da   : > { %1837 = vmatpush3.msra.mxu0 %v2695_v12  ;;  %1833 = vmatprep.mubr.msk.f32.mxu0 %vm467_vm0, %v1112_v51 }
 0x1db   : > { %1844 = vmatprep.subr.msk.mxu0 %vm2734_vm6, %v1324_v52 }
 0x1dc   : > { %1799 = vmatmul.mubr.msk.f32.vlgmr.msra.gmra.mrb[0].mxu1 %vm467_vm0, %v665_v53 }
 0x1dd   : > { %1805 = vmatpush3.msk.msra.mxu1 %vm2734_vm6, %v773_v46  ;;  %1834 = vmatmul.mubr.msk.f32.gmra.mrb[2].mxu0 %vm467_vm0, %v1113_v54 }
 0x1de   : > { %1860 = vmatprep.subr.msk.mxu1 %vm2699_vm4, %v2704_v15  ;;  %1801 = vmatprep.mubr.msk.f32.mxu1 %vm467_vm0, %v666_v55 }
 0x1df   : > { %1838 = vmatprep.mubr.msk.f32.mxu0 %vm467_vm0, %v1216_v56 }
 0x1e0   : > { %1802 = vmatmul.mubr.msk.f32.gmra.mrb[2].mxu1 %vm467_vm0, %v667_v57 }
 0x1e1   : > { %1839 = vmatmul.mubr.msk.f32.vlgmr.msra.gmra.mrb[0].mxu0 %vm467_vm0, %v1217_v58  ;;  %1806 = vmatprep.mubr.msk.f32.mxu1 %vm467_vm0, %v776_v59  ;;  %v1435_v10 = vpop.permute.xlu1 %1434 }
 0x1e2   : > { %1845 = vmatpush3.msk.msra.mxu0 %vm2734_vm6, %v1324_v52  ;;  %1841 = vmatprep.mubr.msk.f32.mxu0 %vm467_vm0, %v1218_v60  ;;  %v1440_v12 = vpop.permute.xlu0 %1439 }
 0x1e4   : > { %1807 = vmatmul.mubr.msk.f32.vlgmr.msra.gmra.mrb[0].mxu1 %vm467_vm0, %v777_v61 }
 0x1e5   : > { %1861 = vmatpush3.msk.msra.mxu1 %vm2699_vm4, %v2704_v15  ;;  %1842 = vmatmul.mubr.msk.f32.gmra.mrb[2].mxu0 %vm467_vm0, %v1219_v62  ;;  %v1445_v17 = vpop.permute.xlu1 %1444 }
 0x1e6   : > { %1809 = vmatprep.mubr.msk.f32.mxu1 %vm467_vm0, %v778_v63  ;;  %1846 = vmatprep.mubr.msk.f32.mxu0 %vm467_vm0, %v1327_v1 }
 0x1e8   : > { %1810 = vmatmul.mubr.msk.f32.gmra.mrb[2].mxu1 %vm467_vm0, %v779_v2 }
 0x1e9   : > { %1847 = vmatmul.mubr.msk.f32.vlgmr.msra.gmra.mrb[0].mxu0 %vm467_vm0, %v1328_v3  ;;  %1817 = vmatprep.mubr.msk.f32.mxu1 %vm467_vm0, %v889_v4  ;;  %v1450_v31 = vpop.permute.xlu1 %1449 }
 0x1ea   : > { %1849 = vmatprep.mubr.msk.f32.mxu0 %vm467_vm0, %v1329_v5 }
 0x1ed   : > { %1850 = vmatmul.mubr.msk.f32.gmra.mrb[2].mxu0 %vm467_vm0, %v1330_v6 }
 0x1f0   : > { %1818 = vmatmul.mubr.msk.f32.vlgmr.msra.gmra.mrb[2].mxu1 %vm467_vm0, %v890_v7 }
 0x2b7   : > { %v1808_v8 = vpop.f32.mrb[0].mxu1 }
 0x2b8   : > { %v858_v9 = vpop.f32.mrb[1].mxu1 }
 0x2bc   : > { %v1848_v11 = vpop.f32.mrb[0].mxu0 }
 0x2bd   : > { %v1862_v13 = vadd.f32 %v1848_v11, %v1808_v8  ;;  %v1409_v14 = vpop.f32.mrb[1].mxu0 }
 0x2be   : > { %v1863_v15 = vadd.f32 %v1409_v14, %v858_v9 }
 0x2bf   : > { %v1453_v16 = vadd.f32 %v1862_v13, %v1440_v12 }
 0x2c0   : > { %v1452_v18 = vadd.f32 %v1863_v15, %v1435_v10  ;;  %v1851_v19 = vpop.f32.mrb[2].mxu0 }
 0x2c1   : > { %v1457_v20 = vmax.f32 %v1453_v16, 0.0  ;;  %v1419_v21 = vpop.f32.mrb[3].mxu0 }
 0x2c2   : > { %v1456_v22 = vmax.f32 %v1452_v18, 0.0 }
 0x2c3   : > { %v1461_v26 = vadd.f32 %v1457_v20, %v2717_v23  ;;  %v1819_v27 = vpop.f32.mrb[2].mxu1 }
 0x2c4   : > { %v1460_v28 = vadd.f32 %v1456_v22, %v2685_v0  ;;  %v1864_v29 = vadd.f32 %v1851_v19, %v1819_v27  ;;  %v979_v30 = vpop.f32.mrb[3].mxu1 }
 0x2c5   : > { %1465 = vst [vmem:[%s409_s1 + $0x8] sm:$0xff] %v1461_v26  ;;  %v1865_v32 = vadd.f32 %v1419_v21, %v979_v30 }
 0x2c6   : > { %1464 = vst [vmem:[%s409_s1] sm:$0xff] %v1460_v28  ;;  %v1455_v33 = vadd.f32 %v1864_v29, %v1450_v31 }
 0x2c7   : > { %v1454_v34 = vadd.f32 %v1865_v32, %v1445_v17 }
 0x2c8   : > { %v1459_v35 = vmax.f32 %v1455_v33, 0.0 }
 0x2c9   : > { %v1458_v0 = vmax.f32 %v1454_v34, 0.0 }
 0x2ca   : > { %v1463_v23 = vadd.f32 %v1459_v35, %v2723_v25 }
 0x2cb   : > { %v1462_v36 = vadd.f32 %v1458_v0, %v2720_v24 }
 0x2cc   : > { %1467 = vst [vmem:[%s409_s1 + $0x18] sm:$0xff] %v1463_v23 }
 0x2cd   : > { %1466 = vst [vmem:[%s409_s1 + $0x10] sm:$0xff] %v1462_v36 }
 0x2ce   : > { %2213 = shalt.err (!%p2210_p5)
}
 0x2cf   : > { %s2214_s28 = scalar_lea.hbm %s2812_s18, 512  ;;  %s2218_s3 = scalar_lea.hbm %s2956_s7, 2048 }
 0x2d0   : > { %p2215_p13 = scmp.ne.s32.totalorder %s2812_s18, %s2214_s28  ;;  %p2219_p7 = scmp.lt.u32.totalorder %s2812_s18, %s2956_s7 }
 0x2d1   : > { %p2220_p1 = scmp.lt.u32.totalorder %s2218_s3, %s2214_s28  ;;  %p2222_p6 = scmp.lt.u32.totalorder %s2214_s28, %s2812_s18 }
 0x2d2   : > { %p2216_p12 = pnand %p2215_p13, %p2957_p9 }
 0x2d3   : > { %p2221_p4 = por %p2220_p1, %p2219_p7 }
 0x2d4   : > { %p2217_p3 = pneg %p2216_p12 }
 0x2d5   : > { %p2223_p10 = por %p2222_p6, %p2221_p4 }
 0x2d7   : > { %p2224_p11 = pnand %p2223_p10, %p2217_p3 }
 0x2d9   : > { %2227 = shalt.err (!%p2224_p11)
}
 0x2da   : > { %s2327_s6 = smov 128   ;;  %s2328_s8 = smov 256  }
 0x2db   : > { %s2329_s10 = smov 8  }
 0x2dc   : > { %1912 = dma.vmem_to_hbm [thread:$0]  (%p2957_p9), %s2806_s11, 512, %s2812_s18, %s1469_s14, %s2327_s6, %s2328_s8, %s2329_s10  }
 0x2dd PF: > { %s2958_s1 = sld [smem:[#allocation23_spill]]  ;;  %s2959_s23 = sld [smem:[#allocation19_spill]] }
 0x2de   : > { %s2960_s29 = sld [smem:[#allocation26_spill]] }
 0x2e3   : > { %p1945_p2 = scmp.ge.s32.totalorder %s2958_s1, 2  ;;  %s1498_s25 = sand.u32 1, %s2959_s23  }
 0x2e4   : > { %p2961_p8 = scmp.ne.s32.totalorder %s2960_s29, 0  ;;  %s1499_s24 = scalar_lea.sflag [#allocation4], %s1498_s25 }
 0x2e6   : > { %p1935_p0 = pnand %p1945_p2, %p2961_p8 }
 0x2e8   : > { %2277 = dma.done.wait (!%p1935_p0), %s1499_s24, 512  }
 0x2e9   : > { %2279 = vsyncadd (!%p1935_p0), %s1499_s24, 4294966784  ;;  %s27_s28 = sadd.s32 1, %s2958_s1   ;;  %s2962_s9 = sld [smem:[#allocation20_spill]] }
 0x2ea   : > { %p24_p5 = scmp.ge.s32.totalorder %s27_s28, 6   ;;  %s2963_s23 = sld [smem:[#allocation30_spill]] }
 0x2eb   : > { %s2964_s12 = sld [smem:[#allocation27_spill]]  ;;  %s2965_s16 = sld [smem:[#allocation29_spill]] }
 0x2ec   : > { %s2966_s21 = smov %s2286_s22  ;;  %s2968_s24 = smov %s2302_s26 }
 0x2ed   : > { %s2969_s25 = smov %s2306_s27  ;;  %26 = sbr.rel (!%p24_p5) target bundleno = 15 (0xf), region = 132 }
 0x2ef   : > { %s2967_s22 = smov %s2962_s9 }
 0x2f1   : > { %s2970_s26 = smov %s2964_s12  ;;  %s2971_s27 = smov %s2965_s16 }
 0x2f4   :  { %1504 = vsyncpa [#allocation3], 1 }
 0x2f5   :  { %1506 = vsyncpa [#allocation3 + $0x1], 1 }
 0x2f6   :  { %1507 = vsyncpa [#allocation6], 1 }
 0x2f7   :  { %1509 = vsyncpa [#allocation6 + $0x1], 1 }
 0x2f8   :  { %1510 = vsyncpa [#allocation9], 1 }
 0x2f9   :  { %1511 = vsyncpa [#allocation12], 1 }
 0x2fa   :  { %1512 = vsyncpa [#allocation4], 1 }
 0x2fb   :  { %1514 = vsyncpa [#allocation4 + $0x1], 1 }

</bundles_post_ra>
